<compile_context>
chip_gen: v6e
topology: v6e:2x2x1
jax: 0.10.0
libtpu: 0.0.40
codegen_flags: <defaults>
</compile_context>

<pallas_src>
import jax
import jax.numpy as jnp
from jax.experimental import pallas as pl
from jax.experimental.pallas import tpu as pltpu

ALPHA = 0.25
GAMMA = 2
LANES = 128
SUBLANES = 8
MAX_BLOCK_ROWS = 2048  # (2048, 128) f32 tile = 1 MiB per input per buffer


def _make_focal_kernel(tm, rows, needs_mask):
    """Builds a kernel that writes an (8, 128) partial sum per grid block."""

    def kernel(logits_ref, label_ref, out_ref):
        x = logits_ref[...].astype(jnp.float32)  # "logits" in [0, 1] (BCELoss)
        y = label_ref[...].astype(jnp.float32)   # binary labels (0/1)

        is_pos = y == 1.0
        alpha = jnp.where(is_pos, jnp.float32(ALPHA), jnp.float32(1.0 - ALPHA))

        probs = jax.nn.sigmoid(x)
        pt = jnp.where(is_pos, probs, 1.0 - probs)

        # nn.BCELoss(reduction='none') on the raw `logits`, log clamped at
        # -100.  Labels are exactly 0/1, so a single select-before-log equals
        # y*clamp(log(x)) + (1-y)*clamp(log(1-x)) while halving the log count.
        ce = -jnp.maximum(jnp.log(jnp.where(is_pos, x, 1.0 - x)),
                          jnp.float32(-100.0))

        one_minus_pt = 1.0 - pt
        if GAMMA == 2:
            focal_w = one_minus_pt * one_minus_pt
        else:
            focal_w = jnp.power(one_minus_pt, jnp.float32(GAMMA))

        loss = alpha * focal_w * ce

        if needs_mask:
            # Zero out rows past the end of the (padded) array in the tail
            # block; garbage there may be NaN/Inf, so select (not multiply).
            row0 = pl.program_id(0) * tm
            row_ids = row0 + jax.lax.broadcasted_iota(jnp.int32, (tm, LANES), 0)
            loss = jnp.where(row_ids < rows, loss, jnp.float32(0.0))

        # Fold the (tm, 128) tile into an (8, 128) partial sum: layout-
        # preserving reshape + elementwise vreg adds (no cross-lane reduce).
        out_ref[...] = jnp.sum(
            loss.reshape(tm // SUBLANES, SUBLANES, LANES), axis=0
        )

    return kernel


def focal_loss(logits, label, reduction="mean"):
    """Pallas TPU focal loss. logits/label: same shape (e.g. NCHW)."""
    n_elems = logits.size

    x = jnp.reshape(logits, (-1,))
    y = jnp.reshape(label, (-1,))

    # Pad the flat length to a multiple of 128 lanes.  Zero padding contributes
    # exactly zero loss (label=0, logits=0 -> ce = -log(1-0) = 0).
    pad = (-n_elems) % LANES
    if pad:
        x = jnp.pad(x, (0, pad))
        y = jnp.pad(y, (0, pad))

    rows = (n_elems + pad) // LANES
    x2d = x.reshape(rows, LANES)
    y2d = y.reshape(rows, LANES)

    # Block rows: as large as possible up to MAX_BLOCK_ROWS, multiple of 8.
    tm = min(MAX_BLOCK_ROWS, ((rows + SUBLANES - 1) // SUBLANES) * SUBLANES)
    n_blocks = pl.cdiv(rows, tm)
    needs_mask = (n_blocks * tm) != rows

    kernel = _make_focal_kernel(tm, rows, needs_mask)

    partials = pl.pallas_call(
        kernel,
        out_shape=jax.ShapeDtypeStruct((n_blocks * SUBLANES, LANES), jnp.float32),
        grid_spec=pltpu.PrefetchScalarGridSpec(
            num_scalar_prefetch=0,
            grid=(n_blocks,),
            in_specs=[
                pl.BlockSpec((tm, LANES), lambda i: (i, 0)),
                pl.BlockSpec((tm, LANES), lambda i: (i, 0)),
            ],
            out_specs=pl.BlockSpec((SUBLANES, LANES), lambda i: (i, 0)),
        ),
        compiler_params=pltpu.CompilerParams(
            dimension_semantics=("parallel",),
        ),
    )(x2d, y2d)

    total = jnp.sum(partials, dtype=jnp.float32)

    if reduction == "mean":
        return total / jnp.float32(n_elems)
    if reduction == "sum":
        return total
    # TODO(synk): reduction='none' needs the full elementwise map output;
    # only 'mean'/'sum' are implemented in the kernel path.
    raise NotImplementedError("reduction='none' not implemented")


def _focal_loss_ref(logits, label, reduction="mean"):
    x = logits.astype(jnp.float32)
    y = label.astype(jnp.float32)
    alpha = jnp.where(y == 1.0, ALPHA, 1.0 - ALPHA)
    probs = jax.nn.sigmoid(x)
    pt = jnp.where(y == 1.0, probs, 1.0 - probs)
    ce = -(y * jnp.maximum(jnp.log(x), -100.0)
           + (1.0 - y) * jnp.maximum(jnp.log(1.0 - x), -100.0))
    loss = alpha * (1.0 - pt) ** GAMMA * ce
    return jnp.mean(loss) if reduction == "mean" else jnp.sum(loss)


if __name__ == "__main__":
    key = jax.random.PRNGKey(0)

    # NCHW inputs; "logits" must lie in (0, 1) since nn.BCELoss is applied to
    # them directly in the reference module.
    k1, k2, k3, k4 = jax.random.split(key, 4)

    shape = (2, 4, 16, 16)
    logits = jax.random.uniform(k1, shape, jnp.float32, 0.01, 0.99)
    label = jax.random.bernoulli(k2, 0.3, shape).astype(jnp.float32)

    out = focal_loss(logits, label, reduction="mean")
    out = jax.block_until_ready(out)
    ref = _focal_loss_ref(logits, label, reduction="mean")
    assert jnp.allclose(out, ref, rtol=1e-5, atol=1e-6), (out, ref)

    # Odd shape: exercises lane padding and tail-row masking.
    shape2 = (3, 5, 9, 11)
    logits2 = jax.random.uniform(k3, shape2, jnp.float32, 0.01, 0.99)
    label2 = jax.random.bernoulli(k4, 0.3, shape2).astype(jnp.float32)

    out2 = focal_loss(logits2, label2, reduction="sum")
    out2 = jax.block_until_ready(out2)
    ref2 = _focal_loss_ref(logits2, label2, reduction="sum")
    assert jnp.allclose(out2, ref2, rtol=1e-5, atol=1e-5), (out2, ref2)

    print("KERNEL_OK")
</pallas_src>

<mosaic_0001>
module attributes {stable_mosaic.version = 11 : i64} {
  func.func @kernel(%arg0: i32, %arg1: memref<16x128xf32, #tpu.memory_space<vmem>>, %arg2: memref<16x128xf32, #tpu.memory_space<vmem>>, %arg3: memref<8x128xf32, #tpu.memory_space<vmem>>) attributes {dimension_semantics = [#tpu.dimension_semantics<parallel>], iteration_bounds = array<i64: 1>, scalar_prefetch = 0 : i64, scratch_operands = 0 : i64, tpu.core_type = #tpu.core_type<tc>, window_params = [{transform_indices = @transform_0, window_bounds = array<i64: 16, 128>}, {transform_indices = @transform_1, window_bounds = array<i64: 16, 128>}, {transform_indices = @transform_2, window_bounds = array<i64: 8, 128>}]} {
    %c0 = arith.constant 0 : index
    %c0_0 = arith.constant 0 : index
    %0 = vector.load %arg1[%c0, %c0_0] : memref<16x128xf32, #tpu.memory_space<vmem>>, vector<16x128xf32>
    %c0_1 = arith.constant 0 : index
    %c0_2 = arith.constant 0 : index
    %1 = vector.load %arg2[%c0_1, %c0_2] : memref<16x128xf32, #tpu.memory_space<vmem>>, vector<16x128xf32>
    %cst = arith.constant 1.000000e+00 : f32
    %2 = vector.broadcast %cst : f32 to vector<16x128xf32>
    %3 = arith.cmpf oeq, %1, %2 : vector<16x128xf32>
    %cst_3 = arith.constant 2.500000e-01 : f32
    %cst_4 = arith.constant 7.500000e-01 : f32
    %4 = vector.broadcast %cst_3 : f32 to vector<16x128xf32>
    %5 = vector.broadcast %cst_4 : f32 to vector<16x128xf32>
    %6 = arith.select %3, %4, %5 : vector<16x128xi1>, vector<16x128xf32>
    %7 = arith.negf %0 : vector<16x128xf32>
    %8 = math.exp %7 : vector<16x128xf32>
    %cst_5 = arith.constant 1.000000e+00 : f32
    %9 = vector.broadcast %cst_5 : f32 to vector<16x128xf32>
    %10 = arith.addf %9, %8 : vector<16x128xf32>
    %11 = arith.divf %9, %10 : vector<16x128xf32>
    %cst_6 = arith.constant 1.000000e+00 : f32
    %12 = vector.broadcast %cst_6 : f32 to vector<16x128xf32>
    %13 = arith.subf %12, %11 : vector<16x128xf32>
    %14 = arith.select %3, %11, %13 : vector<16x128xi1>, vector<16x128xf32>
    %cst_7 = arith.constant 1.000000e+00 : f32
    %15 = vector.broadcast %cst_7 : f32 to vector<16x128xf32>
    %16 = arith.subf %15, %0 : vector<16x128xf32>
    %17 = arith.select %3, %0, %16 : vector<16x128xi1>, vector<16x128xf32>
    %18 = math.log %17 : vector<16x128xf32>
    %cst_8 = arith.constant -1.000000e+02 : f32
    %19 = vector.broadcast %cst_8 : f32 to vector<16x128xf32>
    %20 = arith.maximumf %18, %19 : vector<16x128xf32>
    %cst_9 = arith.constant 0.000000e+00 : f32
    %21 = vector.broadcast %cst_9 : f32 to vector<16x128xf32>
    %22 = arith.subf %21, %20 : vector<16x128xf32>
    %cst_10 = arith.constant 1.000000e+00 : f32
    %23 = vector.broadcast %cst_10 : f32 to vector<16x128xf32>
    %24 = arith.subf %23, %14 : vector<16x128xf32>
    %25 = arith.mulf %24, %24 : vector<16x128xf32>
    %26 = arith.mulf %6, %25 : vector<16x128xf32>
    %27 = arith.mulf %26, %22 : vector<16x128xf32>
    %28 = vector.shape_cast %27 : vector<16x128xf32> to vector<2x8x128xf32>
    %cst_11 = arith.constant dense<0.000000e+00> : vector<8x128xf32>
    %29 = vector.multi_reduction <add>, %28, %cst_11 [0] : vector<2x8x128xf32> to vector<8x128xf32>
    %c0_12 = arith.constant 0 : index
    %c0_13 = arith.constant 0 : index
    %30 = vector.load %arg3[%c0_12, %c0_13] : memref<8x128xf32, #tpu.memory_space<vmem>>, vector<8x128xf32>
    tpu.vector_store %arg3[%c0_12, %c0_13], %29 {strides = array<i32>} : memref<8x128xf32, #tpu.memory_space<vmem>>, vector<8x128xf32>,
    return
  }
  func.func @transform_0(%arg0: i32) -> (i32, i32) {
    %c0_i32 = arith.constant 0 : i32
    %c0_i32_0 = arith.constant 0 : i32
    return %arg0, %c0_i32 : i32, i32
  }
  func.func @transform_1(%arg0: i32) -> (i32, i32) {
    %c0_i32 = arith.constant 0 : i32
    %c0_i32_0 = arith.constant 0 : i32
    return %arg0, %c0_i32 : i32, i32
  }
  func.func @transform_2(%arg0: i32) -> (i32, i32) {
    %c0_i32 = arith.constant 0 : i32
    %c0_i32_0 = arith.constant 0 : i32
    return %arg0, %c0_i32 : i32, i32
  }
}

</mosaic_0001>

<bundles_post_ra>
// kernel: tpu_custom_call.1
= control target key start
LH: loop header
LB: loop body
LE: loop exit
PB: predicated region body
PF: predicated region fallthrough
CT: control target
= control target key end

     0   :  { %7 = vsyncpa [#allocation3], 0  ;;  %s224_s0 = inlined_call_operand.hbm [shape: f32[16,128], index: 0, kind: input, shape index: {}]   ;;  %s225_s1 = inlined_call_operand.hbm [shape: f32[16,128], index: 1, kind: input, shape index: {}]   ;;  %s226_s2 = inlined_call_operand.hbm [shape: f32[8,128], index: 2, kind: output, shape index: {}]  }
   0x1   :  { %8 = vsyncpa [#allocation6], 0 }
   0x2   :  { %9 = vsyncpa [#allocation4], 0  ;;  %s188_s9 = smov [#allocation2]  }
   0x3   :  { %s15_s10 = sshll.u32 %s188_s9, 4  ;;  %s16_s10 = int_to_ptr.vmem [resolvable:$true] %s15_s10 }
   0x4   :  { %s130_s11 = scalar_lea.vmem %s16_s10, 256  ;;  %p135_p1 = scmp.lt.s32.totalorder %s16_s10, %s16_s10 }
   0x5   :  { %p131_p0 = scmp.ne.s32.totalorder %s16_s10, %s130_s11  ;;  %p136_p2 = scmp.lt.s32.totalorder %s130_s11, %s130_s11 }
   0x7   :  { %p137_p3 = por %p136_p2, %p135_p1 }
   0x9   :  { %p138_p4 = pnand %p137_p3, %p131_p0 }
   0xb   :  { %141 = shalt.err (!%p138_p4)
}
   0xc   :  { %s189_s12 = smov 128   ;;  %s190_s13 = smov 8  }
   0xd   :  { %21 = dma.hbm_to_vmem [thread:$0]  %s224_s0, 256, %s16_s10, [#allocation3], %s189_s12, %s189_s12, %s190_s13  }
   0xe   :  { %s191_s16 = smov [#allocation5]  }
   0xf   :  { %s27_s17 = sshll.u32 %s191_s16, 4  ;;  %s28_s17 = int_to_ptr.vmem [resolvable:$true] %s27_s17 }
  0x10   :  { %s150_s18 = scalar_lea.vmem %s28_s17, 256  ;;  %p155_p6 = scmp.lt.s32.totalorder %s28_s17, %s28_s17 }
  0x11   :  { %p151_p5 = scmp.ne.s32.totalorder %s28_s17, %s150_s18  ;;  %p156_p7 = scmp.lt.s32.totalorder %s150_s18, %s150_s18 }
  0x13   :  { %p157_p8 = por %p156_p7, %p155_p6 }
  0x15   :  { %p158_p9 = pnand %p157_p8, %p151_p5 }
  0x17   :  { %161 = shalt.err (!%p158_p9)
}
  0x18   :  { %33 = dma.hbm_to_vmem [thread:$0]  %s225_s1, 256, %s28_s17, [#allocation6], %s189_s12, %s189_s12, %s190_s13  }
  0x19   :  { %182 = dma.done.wait [#allocation3], 256  }
  0x1a   :  { %183 = vsyncadd [#allocation3], 4294967040 }
  0x1b   :  { %184 = dma.done.wait [#allocation6], 256  }
  0x1c   :  { %185 = vsyncadd [#allocation6], 4294967040  ;;  %v40_v0 = vld [vmem:[#allocation2] sm:$0xff]  ;;  %v41_v1 = vld [vmem:[#allocation2 + $0x8] sm:$0xff]  ;;  %v192_v27 = vmov 0.75   ;;  %s193_s0 = smov [#allocation7]  }
  0x1d   :  { %v102_v2 = vmul.f32 -1.442695, %v40_v0  ;;  %v103_v3 = vmul.f32 -1.442695, %v41_v1  ;;  %v42_v4 = vld [vmem:[#allocation5] sm:$0xff]  ;;  %v43_v5 = vld [vmem:[#allocation5 + $0x8] sm:$0xff] }
  0x1e   :  { %v64_v6 = vsub.f32 1.0, %v40_v0  ;;  %vm44_vm0 = vcmp.eq.f32.partialorder %v42_v4, 1.0  ;;  %v65_v7 = vsub.f32 1.0, %v41_v1  ;;  %vm45_vm1 = vcmp.eq.f32.partialorder %v43_v5, 1.0  ;;  %s92_s1 = sshll.u32 %s193_s0, 4  ;;  %s93_s1 = int_to_ptr.vmem [resolvable:$true] %s92_s1 }
  0x1f   :  { %110 = vpow2.f32 %v102_v2  ;;  %v46_v28 = vsel %vm44_vm0, 0.25, %v192_v27  ;;  %v47_v30 = vsel %vm45_vm1, 0.25, %v192_v27  ;;  %s162_s21 = scalar_lea.vmem %s93_s1, 128  ;;  %p167_p11 = scmp.lt.s32.totalorder %s93_s1, %s93_s1 }
  0x20   :  { %112 = vpow2.f32 %v103_v3  ;;  %v66_v8 = vsel %vm44_vm0, %v40_v0, %v64_v6  ;;  %v67_v9 = vsel %vm45_vm1, %v41_v1, %v65_v7  ;;  %p163_p10 = scmp.ne.s32.totalorder %s93_s1, %s162_s21  ;;  %p168_p12 = scmp.lt.s32.totalorder %s162_s21, %s162_s21 }
  0x21   :  { %114 = vlog2.f32 %v66_v8 }
  0x22   :  { %116 = vlog2.f32 %v67_v9  ;;  %p169_p13 = por %p168_p12, %p167_p11 }
  0x24   :  { %p170_p0 = pnand %p169_p13, %p163_p10 }
  0x2c   :  { %v111_v10 = vpop.eup %110 }
  0x2d   :  { %v113_v11 = vpop.eup %112  ;;  %v54_v12 = vadd.f32 1.0, %v111_v10 }
  0x2e   :  { %v55_v13 = vadd.f32 1.0, %v113_v11  ;;  %v115_v14 = vpop.eup %114 }
  0x2f   :  { %118 = vrcp.f32 %v54_v12  ;;  %v117_v15 = vpop.eup %116  ;;  %v69_v16 = vmul.f32 0.6931472, %v115_v14 }
  0x30   :  { %120 = vrcp.f32 %v55_v13  ;;  %v71_v17 = vmul.f32 0.6931472, %v117_v15 }
  0x31   :  { %v72_v22 = vmax.f32 %v69_v16, -100.0 }
  0x32   :  { %v73_v24 = vmax.f32 %v71_v17, -100.0 }
  0x33   :  { %v74_v31 = vsub.f32 0.0, %v72_v22 }
  0x34   :  { %v75_v33 = vsub.f32 0.0, %v73_v24 }
  0x3c   :  { %v119_v18 = vpop.eup %118 }
  0x3d   :  { %v121_v19 = vpop.eup %120  ;;  %v60_v20 = vsub.f32 1.0, %v119_v18 }
  0x3e   :  { %v61_v21 = vsub.f32 1.0, %v121_v19 }
  0x3f   :  { %v62_v23 = vsel %vm44_vm0, %v119_v18, %v60_v20 }
  0x40   :  { %v63_v25 = vsel %vm45_vm1, %v121_v19, %v61_v21  ;;  %v76_v26 = vsub.f32 1.0, %v62_v23 }
  0x41   :  { %v77_v29 = vsub.f32 1.0, %v63_v25 }
  0x42   :  { %v78_v32 = vmul.f32 %v76_v26, %v76_v26 }
  0x43   :  { %v79_v34 = vmul.f32 %v77_v29, %v77_v29 }
  0x44   :  { %v80_v35 = vmul.f32 %v78_v32, %v46_v28 }
  0x45   :  { %v81_v36 = vmul.f32 %v79_v34, %v47_v30 }
  0x46   :  { %v82_v37 = vmul.f32 %v80_v35, %v74_v31 }
  0x47   :  { %v83_v38 = vmul.f32 %v81_v36, %v75_v33 }
  0x49   :  { %v84_v39 = vadd.f32 %v83_v38, %v82_v37 }
  0x4b   :  { %85 = vst [vmem:[#allocation7] sm:$0xff] %v84_v39 }
  0x4c   :  { %173 = shalt.err (!%p170_p0)
}
  0x4d   :  { %95 = dma.vmem_to_hbm [thread:$0]  %s93_s1, 128, %s226_s2, [#allocation4]  }
  0x4e   :  { %186 = dma.done.wait [#allocation4], 128  }
  0x4f   :  { %187 = vsyncadd [#allocation4], 4294967168 }
  0x50   :  { %99 = vsyncpa [#allocation3], 1 }
  0x51   :  { %100 = vsyncpa [#allocation6], 1 }
  0x52   :  { %101 = vsyncpa [#allocation4], 1 }

</bundles_post_ra>
